<compile_context>
chip_gen: v6e
topology: v6e:2x2x1
jax: 0.10.0
libtpu: 0.0.40
codegen_flags: <defaults>
</compile_context>

<pallas_src>
import functools

import jax
import jax.numpy as jnp
from jax import lax
from jax.experimental import pallas as pl
from jax.experimental.pallas import tpu as pltpu


@functools.lru_cache(maxsize=1)
def _roll_shift_sign():
    """Resolve pltpu.roll's rotation direction once with a tiny probe kernel.

    Returns +1 if pltpu.roll follows jnp.roll semantics
    (result[i] == x[i - shift]), else -1.
    """
    def probe(x_ref, o_ref):
        o_ref[...] = pltpu.roll(x_ref[...], shift=1, axis=0)

    x = jnp.arange(8 * 128, dtype=jnp.int32).reshape(8, 128)
    out = pl.pallas_call(
        probe, out_shape=jax.ShapeDtypeStruct((8, 128), jnp.int32))(x)
    return 1 if int(out[1, 0]) == int(x[0, 0]) else -1


def _make_convblock_kernel(npad, W1, Cout, apply_relu):
    """Per-batch-element kernel: 2x2 stride-1 conv on s2d rows + bias + ReLU.

    Refs (one batch element per grid step):
      x_ref : (1, npad, 4*Cin) bf16  flattened s2d input rows, row m = i*W1 + j
      w_ref : (4, 4*Cin, Cout) bf16  tap weights, tap t = dy*2 + dx
      b_ref : (1, Cout)        f32   conv bias
      o_ref : (1, npad, Cout)  f32   full-width flat output (cropped in wrapper)
    """
    offsets = (0, 1, W1, W1 + 1)          # flat row offset of tap (dy, dx)
    sign = _roll_shift_sign()

    def kernel(x_ref, w_ref, b_ref, o_ref):
        xf = x_ref[0]                                     # (npad, 4*Cin) bf16
        acc = jnp.zeros((npad, Cout), jnp.float32)
        for t, off in enumerate(offsets):
            # MXU: bf16 x bf16 operands, f32 accumulation.
            z = jnp.dot(xf, w_ref[t], preferred_element_type=jnp.float32)
            if off:
                # out[m] needs x[m + off]: shift the partial product by `off`
                # rows with an XLU sublane rotation (no strided VMEM copies).
                # Wrapped rows only land in positions the wrapper crops away.
                shift = (npad - off) if sign > 0 else off
                z = pltpu.roll(z, shift=shift, axis=0)
            acc = acc + z
        acc = acc + b_ref[...]                            # conv bias
        if apply_relu:
            acc = jnp.maximum(acc, 0.0)                   # ReLU
        o_ref[0] = acc

    return kernel


def convblock_pallas(x_nhwc, w_hwio, b, *, apply_relu=True):
    """One ConvBlock: Conv2d(k=4, s=2, p=0, bias=True) -> Identity -> ReLU."""
    N, H, W, Cin = x_nhwc.shape
    assert w_hwio.shape[:3] == (4, 4, Cin), w_hwio.shape
    Cout = w_hwio.shape[-1]
    Ho = (H - 4) // 2 + 1
    Wo = (W - 4) // 2 + 1
    H1, W1 = Ho + 1, Wo + 1
    C4 = 4 * Cin

    # Crop to the 2*H1 x 2*W1 region actually touched by the conv, cast to
    # bf16 (halves the HBM read, feeds the MXU fast path), space-to-depth by
    # 2 (c4 = (p*2+q)*Cin + cin for pixel (2i+p, 2j+q)) and flatten rows.
    xs = x_nhwc[:, :2 * H1, :2 * W1, :].astype(jnp.bfloat16)
    xs = xs.reshape(N, H1, 2, W1, 2, Cin).transpose(0, 1, 3, 2, 4, 5)
    xf = xs.reshape(N, H1 * W1, C4)                    # row m = i*W1 + j

    # Pad the (sublane) row count to a multiple of 8 so the kernel only ever
    # touches exact-tile arrays. This is a handful of rows fused into the s2d
    # transpose -- NOT the full-image halo pad the previous version paid.
    n_rows = H1 * W1
    npad = -(-n_rows // 8) * 8
    if npad != n_rows:
        xf = jnp.pad(xf, ((0, 0), (0, npad - n_rows), (0, 0)))

    # Regroup the 4x4 HWIO weights into the 4 taps of a 2x2 conv on s2d input:
    # wk[dy*2+dx, (p*2+q)*Cin + cin, cout] = w_hwio[2*dy+p, 2*dx+q, cin, cout]
    wk = (w_hwio.reshape(2, 2, 2, 2, Cin, Cout)        # (dy, p, dx, q, ci, co)
                .transpose(0, 2, 1, 3, 4, 5)           # (dy, dx, p, q, ci, co)
                .reshape(4, C4, Cout)
                .astype(jnp.bfloat16))
    bk = b.reshape(1, Cout).astype(jnp.float32)

    kernel = _make_convblock_kernel(npad, W1, Cout, apply_relu)

    # VMEM budget: double-buffered input/output blocks + (double-buffered)
    # weights/bias. Capped at 64 MiB (v7x physical); demo shapes are tiny.
    bytes_x = 2 * npad * C4 * 2
    bytes_o = 2 * npad * Cout * 4
    bytes_w = 2 * (4 * C4 * Cout * 2 + Cout * 4)
    vmem_limit = int(min(max(2 * (bytes_x + bytes_o + bytes_w), 32 * 2**20),
                         64 * 2**20))

    out_full = pl.pallas_call(
        kernel,
        out_shape=jax.ShapeDtypeStruct((N, npad, Cout), jnp.float32),
        grid=(N,),
        in_specs=[
            pl.BlockSpec((1, npad, C4), lambda n: (n, 0, 0)),
            pl.BlockSpec((4, C4, Cout), lambda n: (0, 0, 0)),
            pl.BlockSpec((1, Cout), lambda n: (0, 0)),
        ],
        out_specs=pl.BlockSpec((1, npad, Cout), lambda n: (n, 0, 0)),
        compiler_params=pltpu.CompilerParams(
            dimension_semantics=("parallel",),
            vmem_limit_bytes=vmem_limit),
    )(xf, wk, bk)

    # Crop to the valid output window. Under jit this slice fuses with the
    # next layer's s2d pass (or the final NHWC->NCHW transpose).
    out = out_full[:, :n_rows, :].reshape(N, H1, W1, Cout)[:, :Ho, :Wo, :]
    return out


@jax.jit
def convblocks_forward(x_nchw, params_list):
    """ConvBlocks forward. NCHW in/out to mirror the PyTorch module."""
    x = jnp.transpose(x_nchw, (0, 2, 3, 1)).astype(jnp.float32)  # NCHW -> NHWC
    for p in params_list:
        x = convblock_pallas(x, p["w"], p["b"], apply_relu=True)
    return jnp.transpose(x, (0, 3, 1, 2))                        # NHWC -> NCHW


# ---------------------------------------------------------------------------
# Pure-JAX reference (for correctness check of the Pallas kernels).
# ---------------------------------------------------------------------------
def _ref_convblock(x_nhwc, w_hwio, b, apply_relu=True):
    y = lax.conv_general_dilated(
        x_nhwc, w_hwio, window_strides=(2, 2), padding=((0, 0), (0, 0)),
        dimension_numbers=("NHWC", "HWIO", "NHWC"))
    y = y + b.reshape(1, 1, 1, -1)
    if apply_relu:
        y = jnp.maximum(y, 0.0)
    return y


def _ref_convblocks(x_nchw, params_list):
    x = jnp.transpose(x_nchw, (0, 2, 3, 1)).astype(jnp.float32)
    for p in params_list:
        x = _ref_convblock(x, p["w"], p["b"])
    return jnp.transpose(x, (0, 3, 1, 2))


# ---------------------------------------------------------------------------
# Deterministic synthetic parameters matching ConvBlocks' channel doubling.
# ---------------------------------------------------------------------------
def init_params(key, layer_multiplier, max_layer_multiplier):
    """Each block: Conv2d(c, 2c, kernel_size=4, stride=2, padding=0, bias).

    Weights stored HWIO (4, 4, Cin, Cout); bias (Cout,).
    """
    params = []
    c = layer_multiplier
    while c < max_layer_multiplier:
        cout = 2 * c
        key, kw, kb = jax.random.split(key, 3)
        scale = 1.0 / jnp.sqrt(16.0 * c)       # keep activations well-scaled
        params.append({
            "w": scale * jax.random.normal(kw, (4, 4, c, cout), jnp.float32),
            "b": 0.1 * jax.random.normal(kb, (cout,), jnp.float32),
        })
        c = cout
    return params


if __name__ == "__main__":
    # Small shapes consistent with the module: channel doubling 4 -> 8 -> 16
    # over two ConvBlocks, spatial 16 -> 7 -> 2 (k=4, s=2, p=0).
    N, C, H, W = 2, 4, 16, 16
    LAYER_MULT, MAX_LAYER_MULT = C, 4 * C      # two blocks: 4->8, 8->16

    key = jax.random.PRNGKey(0)
    key, kx = jax.random.split(key)
    x = jax.random.normal(kx, (N, C, H, W), jnp.float32)   # NCHW like PyTorch

    params = init_params(key, LAYER_MULT, MAX_LAYER_MULT)

    _roll_shift_sign()   # resolve the roll convention once, outside jit

    out = jax.block_until_ready(convblocks_forward(x, params))
    ref = jax.block_until_ready(_ref_convblocks(x, params))

    assert out.shape == ref.shape, (out.shape, ref.shape)
    err = float(jnp.max(jnp.abs(out - ref)))
    scale = float(jnp.max(jnp.abs(ref)))
    # bf16 MXU operands (f32 accumulation): loosen tolerance vs f32 reference.
    assert err <= 5e-2 * max(1.0, scale), (err, scale)

    print("KERNEL_OK")
</pallas_src>

<mosaic_0001>
module attributes {stable_mosaic.version = 11 : i64} {
  func.func @probe(%arg0: memref<8x128xi32, #tpu.memory_space<vmem>>, %arg1: memref<8x128xi32, #tpu.memory_space<vmem>>) attributes {dimension_semantics = [], scalar_prefetch = 0 : i64, scratch_operands = 0 : i64, tpu.core_type = #tpu.core_type<tc>} {
    %c0 = arith.constant 0 : index
    %c0_0 = arith.constant 0 : index
    %0 = vector.load %arg0[%c0, %c0_0] : memref<8x128xi32, #tpu.memory_space<vmem>>, vector<8x128xi32>
    %c1_i32 = arith.constant 1 : i32
    %1 = tpu.dynamic_rotate %0 by %c1_i32 dim 0 : vector<8x128xi32>, i32 -> vector<8x128xi32>
    %c0_1 = arith.constant 0 : index
    %c0_2 = arith.constant 0 : index
    %2 = vector.load %arg1[%c0_1, %c0_2] : memref<8x128xi32, #tpu.memory_space<vmem>>, vector<8x128xi32>
    tpu.vector_store %arg1[%c0_1, %c0_2], %1 {strides = array<i32>} : memref<8x128xi32, #tpu.memory_space<vmem>>, vector<8x128xi32>,
    return
  }
}

</mosaic_0001>

<bundles_post_ra>
// kernel: tpu_custom_call.1
= control target key start
LH: loop header
LB: loop body
LE: loop exit
PB: predicated region body
PF: predicated region fallthrough
CT: control target
= control target key end

     0   :  { %6 = vsyncpa [#allocation3], 0  ;;  %s103_s0 = inlined_call_operand.hbm [shape: s32[8,128], index: 0, kind: input, shape index: {}]   ;;  %s104_s1 = inlined_call_operand.hbm [shape: s32[8,128], index: 1, kind: output, shape index: {}]  }
   0x1   :  { %7 = vsyncpa [#allocation4], 0  ;;  %s85_s6 = smov [#allocation2]  }
   0x2   :  { %s14_s7 = sshll.u32 %s85_s6, 4  ;;  %s15_s7 = int_to_ptr.vmem [resolvable:$true] %s14_s7 }
   0x3   :  { %s49_s8 = scalar_lea.vmem %s15_s7, 128  ;;  %p54_p1 = scmp.lt.s32.totalorder %s15_s7, %s15_s7 }
   0x4   :  { %p50_p0 = scmp.ne.s32.totalorder %s15_s7, %s49_s8  ;;  %p55_p2 = scmp.lt.s32.totalorder %s49_s8, %s49_s8 }
   0x6   :  { %p56_p3 = por %p55_p2, %p54_p1 }
   0x8   :  { %p57_p4 = pnand %p56_p3, %p50_p0 }
   0xa   :  { %60 = shalt.err (!%p57_p4)
}
   0xb   :  { %17 = dma.hbm_to_vmem [thread:$0]  %s103_s0, 128, %s15_s7, [#allocation3]  }
   0xc   :  { %81 = dma.done.wait [#allocation3], 128  }
   0xd   :  { %82 = vsyncadd [#allocation3], 4294967168  ;;  %s86_s11 = smov [#allocation5]   ;;  %v21_v0 = vld [vmem:[#allocation2] sm:$0xff] }
   0xe   :  { %s30_s12 = sshll.u32 %s86_s11, 4  ;;  %v22_v1 = vrot.slane %v21_v0, 7  ;;  %s31_s12 = int_to_ptr.vmem [resolvable:$true] %s30_s12 }
   0xf   :  { %s61_s13 = scalar_lea.vmem %s31_s12, 128  ;;  %p66_p6 = scmp.lt.s32.totalorder %s31_s12, %s31_s12 }
  0x10   :  { %23 = vst [vmem:[#allocation5] sm:$0xff] %v22_v1  ;;  %p62_p5 = scmp.ne.s32.totalorder %s31_s12, %s61_s13  ;;  %p67_p7 = scmp.lt.s32.totalorder %s61_s13, %s61_s13 }
  0x12   :  { %p68_p8 = por %p67_p7, %p66_p6 }
  0x14   :  { %p69_p9 = pnand %p68_p8, %p62_p5 }
  0x16   :  { %72 = shalt.err (!%p69_p9)
}
  0x17   :  { %33 = dma.vmem_to_hbm [thread:$0]  %s31_s12, 128, %s104_s1, [#allocation4]  }
  0x18   :  { %83 = dma.done.wait [#allocation4], 128  }
  0x19   :  { %84 = vsyncadd [#allocation4], 4294967168 }
  0x1a   :  { %37 = vsyncpa [#allocation3], 1 }
  0x1b   :  { %38 = vsyncpa [#allocation4], 1 }

</bundles_post_ra>
